<compile_context>
chip_gen: v6e
topology: v6e:2x2x1
jax: 0.10.0
libtpu: 0.0.40
codegen_flags: <defaults>
</compile_context>

<pallas_src>
import functools
import math

import jax
import jax.numpy as jnp
from jax import lax
from jax.experimental import pallas as pl
from jax.experimental.pallas import tpu as pltpu


def _self_attention_kernel(x_ref, wq_ref, wk_ref, wv_ref, o_ref, *, scale):
    """Fused causal self-attention for one batch block.

    x_ref : (Bb, T, E)      input embeddings (native dtype)
    w*_ref: (E, A_pad)      pre-transposed, lane-padded weights (y = x @ W)
    o_ref : (Bb, T, A_pad)  lane-dense output block
    """
    Bb, T, E = x_ref.shape
    A_pad = wq_ref.shape[1]
    cdt = x_ref.dtype  # MXU operand dtype (bf16 fast path on v6e/v7x)

    # One big (Bb*T, E) LHS so the three projections fill the MXU M dimension
    # instead of Bb tiny matmuls; accumulate in f32.
    x2d = x_ref[...].reshape(Bb * T, E)
    q = jnp.dot(x2d, wq_ref[...],
                preferred_element_type=jnp.float32).reshape(Bb, T, A_pad)
    k = jnp.dot(x2d, wk_ref[...],
                preferred_element_type=jnp.float32).reshape(Bb, T, A_pad)
    v = jnp.dot(x2d, wv_ref[...],
                preferred_element_type=jnp.float32).reshape(Bb, T, A_pad)

    # scores[b,i,j] = q[b,i,:] . k[b,j,:]  — batched dot_general contracting
    # the last axis of both operands: no explicit k.T is materialized.
    # Padded A columns are zero, so the contraction is unchanged.
    scores = jnp.einsum("bid,bjd->bij", q.astype(cdt), k.astype(cdt),
                        preferred_element_type=jnp.float32) * scale

    # Causal mask: keep row >= col.  Large finite negative instead of -inf so
    # a fully-masked row could never produce NaNs if the mask is generalized.
    row = lax.broadcasted_iota(jnp.int32, (Bb, T, T), 1)
    col = lax.broadcasted_iota(jnp.int32, (Bb, T, T), 2)
    scores = jnp.where(row >= col, scores, -1e30)

    # Numerically-stable softmax, kept in f32 (v5e has no bf16 VPU/EUP).
    m = jnp.max(scores, axis=-1, keepdims=True)
    p = jnp.exp(scores - m)
    denom = jnp.sum(p, axis=-1, keepdims=True)
    inv = pl.reciprocal(denom, approx=True)   # EUP slot — effectively free
    inv = inv * (2.0 - denom * inv)           # one Newton step -> f32 accuracy
    probs = p * inv

    out = jnp.einsum("bij,bjd->bid", probs.astype(cdt), v.astype(cdt),
                     preferred_element_type=jnp.float32)
    o_ref[...] = out.astype(o_ref.dtype)


def _pick_batch_block(B, T, target_m=256):
    """Largest batch block Bb (a divisor of B) with Bb*T <= target_m, while
    preferring to keep >=2 grid steps so both v7x TensorCores get work."""
    candidates = [d for d in range(1, B + 1) if B % d == 0 and d * T <= target_m]
    if not candidates:
        return 1
    multi = [d for d in candidates if B // d >= 2]
    return max(multi) if multi else max(candidates)


def self_attention_forward(embeds, w_query, w_key, w_value, *, block_b=None):
    """Pallas forward of the PyTorch SelfAttention module.

    Returns (attention_output, attention_output.shape); the PyTorch forward
    only returns the shape, so the second element reproduces its semantics.
    Weights follow the nn.Linear convention: shape [attention_dim, embedding_dim].
    """
    B, T, E = embeds.shape
    A = w_query.shape[0]
    scale = 1.0 / math.sqrt(A)

    # One-time wrapper-side weight prep: pre-transpose to [E, A] and zero-pad
    # the attention dim to a multiple of 128 for lane-dense stores/matmuls.
    A_pad = ((A + 127) // 128) * 128

    def _prep(w):
        wt = jnp.swapaxes(w, 0, 1).astype(embeds.dtype)   # (E, A)
        if A_pad != A:
            wt = jnp.pad(wt, ((0, 0), (0, A_pad - A)))
        return wt

    wq_t, wk_t, wv_t = _prep(w_query), _prep(w_key), _prep(w_value)

    Bb = block_b if block_b is not None else _pick_batch_block(B, T)
    grid = (B // Bb,)

    kernel = functools.partial(_self_attention_kernel, scale=scale)

    out_padded = pl.pallas_call(
        kernel,
        out_shape=jax.ShapeDtypeStruct((B, T, A_pad), embeds.dtype),
        grid_spec=pltpu.PrefetchScalarGridSpec(
            num_scalar_prefetch=0,
            grid=grid,
            in_specs=[
                pl.BlockSpec((Bb, T, E), lambda b: (b, 0, 0)),
                # Constant index_maps keep the small weight tiles VMEM-resident
                # across every grid step.
                pl.BlockSpec((E, A_pad), lambda b: (0, 0)),
                pl.BlockSpec((E, A_pad), lambda b: (0, 0)),
                pl.BlockSpec((E, A_pad), lambda b: (0, 0)),
            ],
            out_specs=pl.BlockSpec((Bb, T, A_pad), lambda b: (b, 0, 0)),
        ),
        compiler_params=pltpu.CompilerParams(
            dimension_semantics=("parallel",)),
    )(embeds, wq_t, wk_t, wv_t)

    out = out_padded[..., :A]
    # TODO(synk): for long sequences, switch to a flash-style (B, T//tq, T//tk)
    # grid with an online-softmax VMEM accumulator instead of the full (T, T)
    # scores tile (re-derive tile sizes for v7x's 64 MiB VMEM).
    return out, out.shape


def _reference(embeds, w_query, w_key, w_value):
    # Pure-JAX reference mirroring the PyTorch forward.
    q = embeds @ w_query.T
    k = embeds @ w_key.T
    v = embeds @ w_value.T
    A = k.shape[-1]
    T = k.shape[1]
    scores = q @ jnp.swapaxes(k, 1, 2) / math.sqrt(A)
    mask = jnp.tril(jnp.ones((T, T))) == 0
    scores = jnp.where(mask[None, :, :], -jnp.inf, scores)
    probs = jax.nn.softmax(scores, axis=-1)
    return probs @ v


if __name__ == "__main__":
    # Small shapes consistent with the module: batch=2, seq=8,
    # embedding_dim=32, attention_dim=16.
    B, T, E, A = 2, 8, 32, 16

    key = jax.random.PRNGKey(0)
    k_x, k_q, k_k, k_v = jax.random.split(key, 4)

    embeds = jax.random.normal(k_x, (B, T, E), dtype=jnp.float32)
    # Deterministic synthetic weights (nn.Linear weight shape: [out, in]).
    bound = 1.0 / math.sqrt(E)
    w_query = jax.random.uniform(k_q, (A, E), jnp.float32, -bound, bound)
    w_key = jax.random.uniform(k_k, (A, E), jnp.float32, -bound, bound)
    w_value = jax.random.uniform(k_v, (A, E), jnp.float32, -bound, bound)

    out, out_shape = self_attention_forward(embeds, w_query, w_key, w_value)
    out = jax.block_until_ready(out)

    ref = _reference(embeds, w_query, w_key, w_value)
    assert out_shape == (B, T, A), out_shape
    # Tolerance covers the EUP approx-reciprocal (+ Newton refinement) used
    # for the softmax normalization.
    assert jnp.allclose(out, ref, atol=1e-4, rtol=1e-4), float(
        jnp.max(jnp.abs(out - ref)))

    print("KERNEL_OK")
</pallas_src>

<mosaic_0001>
module attributes {stable_mosaic.version = 11 : i64} {
  func.func @_self_attention_kernel(%arg0: i32, %arg1: memref<1x8x32xf32, #tpu.memory_space<vmem>>, %arg2: memref<32x128xf32, #tpu.memory_space<vmem>>, %arg3: memref<32x128xf32, #tpu.memory_space<vmem>>, %arg4: memref<32x128xf32, #tpu.memory_space<vmem>>, %arg5: memref<1x8x128xf32, #tpu.memory_space<vmem>>) attributes {dimension_semantics = [#tpu.dimension_semantics<parallel>], iteration_bounds = array<i64: 2>, scalar_prefetch = 0 : i64, scratch_operands = 0 : i64, tpu.core_type = #tpu.core_type<tc>, window_params = [{transform_indices = @transform_0, window_bounds = array<i64: 1, 8, 32>}, {pipeline_mode = #tpu.pipeline_mode<synchronous>, transform_indices = @transform_1, window_bounds = array<i64: 32, 128>}, {pipeline_mode = #tpu.pipeline_mode<synchronous>, transform_indices = @transform_2, window_bounds = array<i64: 32, 128>}, {pipeline_mode = #tpu.pipeline_mode<synchronous>, transform_indices = @transform_3, window_bounds = array<i64: 32, 128>}, {transform_indices = @transform_4, window_bounds = array<i64: 1, 8, 128>}]} {
    %c0 = arith.constant 0 : index
    %c0_0 = arith.constant 0 : index
    %c0_1 = arith.constant 0 : index
    %0 = vector.load %arg1[%c0, %c0_0, %c0_1] : memref<1x8x32xf32, #tpu.memory_space<vmem>>, vector<1x8x32xf32>
    %1 = vector.shape_cast %0 : vector<1x8x32xf32> to vector<8x32xf32>
    %c0_2 = arith.constant 0 : index
    %c0_3 = arith.constant 0 : index
    %2 = vector.load %arg2[%c0_2, %c0_3] : memref<32x128xf32, #tpu.memory_space<vmem>>, vector<32x128xf32>
    %cst = arith.constant dense<0.000000e+00> : vector<8x128xf32>
    %3 = tpu.matmul %1, %2, %cst {dimension_numbers = #tpu.dot_dimension_numbers<[1], [0], [0], [1], [0, 0, 1, 1], [], []>} : vector<8x32xf32>, vector<32x128xf32>, vector<8x128xf32> -> vector<8x128xf32>
    %4 = vector.shape_cast %3 : vector<8x128xf32> to vector<1x8x128xf32>
    %c0_4 = arith.constant 0 : index
    %c0_5 = arith.constant 0 : index
    %5 = vector.load %arg3[%c0_4, %c0_5] : memref<32x128xf32, #tpu.memory_space<vmem>>, vector<32x128xf32>
    %cst_6 = arith.constant dense<0.000000e+00> : vector<8x128xf32>
    %6 = tpu.matmul %1, %5, %cst_6 {dimension_numbers = #tpu.dot_dimension_numbers<[1], [0], [0], [1], [0, 0, 1, 1], [], []>} : vector<8x32xf32>, vector<32x128xf32>, vector<8x128xf32> -> vector<8x128xf32>
    %7 = vector.shape_cast %6 : vector<8x128xf32> to vector<1x8x128xf32>
    %c0_7 = arith.constant 0 : index
    %c0_8 = arith.constant 0 : index
    %8 = vector.load %arg4[%c0_7, %c0_8] : memref<32x128xf32, #tpu.memory_space<vmem>>, vector<32x128xf32>
    %cst_9 = arith.constant dense<0.000000e+00> : vector<8x128xf32>
    %9 = tpu.matmul %1, %8, %cst_9 {dimension_numbers = #tpu.dot_dimension_numbers<[1], [0], [0], [1], [0, 0, 1, 1], [], []>} : vector<8x32xf32>, vector<32x128xf32>, vector<8x128xf32> -> vector<8x128xf32>
    %10 = vector.shape_cast %9 : vector<8x128xf32> to vector<1x8x128xf32>
    "tpu.trace_start"() <{level = 10 : i32, message = "bid,bjd->bij"}> : () -> ()
    %cst_10 = arith.constant dense<0.000000e+00> : vector<1x8x8xf32>
    %11 = tpu.matmul %4, %7, %cst_10 {dimension_numbers = #tpu.dot_dimension_numbers<[2], [2], [1], [1], [0, 0, 0, 1, 1, 1], [0], [0]>} : vector<1x8x128xf32>, vector<1x8x128xf32>, vector<1x8x8xf32> -> vector<1x8x8xf32>
    "tpu.trace_stop"() : () -> ()
    %cst_11 = arith.constant 2.500000e-01 : f32
    %12 = vector.broadcast %cst_11 : f32 to vector<1x8x8xf32>
    %13 = arith.mulf %11, %12 : vector<1x8x8xf32>
    %14 = tpu.iota {dimensions = array<i32: 1>} : vector<1x8x8xi32>
    %15 = tpu.iota {dimensions = array<i32: 2>} : vector<1x8x8xi32>
    %16 = arith.cmpi sge, %14, %15 : vector<1x8x8xi32>
    %cst_12 = arith.constant -1.000000e+30 : f32
    %17 = vector.broadcast %cst_12 : f32 to vector<1x8x8xf32>
    %18 = arith.select %16, %13, %17 : vector<1x8x8xi1>, vector<1x8x8xf32>
    %cst_13 = arith.constant dense<0xFF800000> : vector<1x8xf32>
    %19 = vector.multi_reduction <maximumf>, %18, %cst_13 [2] : vector<1x8x8xf32> to vector<1x8xf32>
    %20 = vector.shape_cast %19 : vector<1x8xf32> to vector<1x8x1xf32>
    %21 = vector.broadcast %20 : vector<1x8x1xf32> to vector<1x8x8xf32>
    %22 = arith.subf %18, %21 : vector<1x8x8xf32>
    %23 = math.exp %22 : vector<1x8x8xf32>
    %cst_14 = arith.constant dense<0.000000e+00> : vector<1x8xf32>
    %24 = vector.multi_reduction <add>, %23, %cst_14 [2] : vector<1x8x8xf32> to vector<1x8xf32>
    %25 = vector.shape_cast %24 : vector<1x8xf32> to vector<1x8x1xf32>
    %26 = tpu.reciprocal %25 {approx = true} : vector<1x8x1xf32> -> vector<1x8x1xf32>
    %27 = arith.mulf %25, %26 : vector<1x8x1xf32>
    %cst_15 = arith.constant 2.000000e+00 : f32
    %28 = vector.broadcast %cst_15 : f32 to vector<1x8x1xf32>
    %29 = arith.subf %28, %27 : vector<1x8x1xf32>
    %30 = arith.mulf %26, %29 : vector<1x8x1xf32>
    %31 = vector.broadcast %30 : vector<1x8x1xf32> to vector<1x8x8xf32>
    %32 = arith.mulf %23, %31 : vector<1x8x8xf32>
    "tpu.trace_start"() <{level = 10 : i32, message = "bij,bjd->bid"}> : () -> ()
    %cst_16 = arith.constant dense<0.000000e+00> : vector<1x8x128xf32>
    %33 = tpu.matmul %32, %10, %cst_16 {dimension_numbers = #tpu.dot_dimension_numbers<[2], [1], [1], [2], [0, 0, 0, 1, 1, 2], [0], [0]>} : vector<1x8x8xf32>, vector<1x8x128xf32>, vector<1x8x128xf32> -> vector<1x8x128xf32>
    "tpu.trace_stop"() : () -> ()
    %c0_17 = arith.constant 0 : index
    %c0_18 = arith.constant 0 : index
    %c0_19 = arith.constant 0 : index
    %34 = vector.load %arg5[%c0_17, %c0_18, %c0_19] : memref<1x8x128xf32, #tpu.memory_space<vmem>>, vector<1x8x128xf32>
    tpu.vector_store %arg5[%c0_17, %c0_18, %c0_19], %33 {strides = array<i32>} : memref<1x8x128xf32, #tpu.memory_space<vmem>>, vector<1x8x128xf32>,
    return
  }
  func.func @transform_0(%arg0: i32) -> (i32, i32, i32) {
    %c0_i32 = arith.constant 0 : i32
    %c0_i32_0 = arith.constant 0 : i32
    %c0_i32_1 = arith.constant 0 : i32
    return %arg0, %c0_i32, %c0_i32_0 : i32, i32, i32
  }
  func.func @transform_1(%arg0: i32) -> (i32, i32) {
    %c0_i32 = arith.constant 0 : i32
    %c0_i32_0 = arith.constant 0 : i32
    %c0_i32_1 = arith.constant 0 : i32
    return %c0_i32, %c0_i32_0 : i32, i32
  }
  func.func @transform_2(%arg0: i32) -> (i32, i32) {
    %c0_i32 = arith.constant 0 : i32
    %c0_i32_0 = arith.constant 0 : i32
    %c0_i32_1 = arith.constant 0 : i32
    return %c0_i32, %c0_i32_0 : i32, i32
  }
  func.func @transform_3(%arg0: i32) -> (i32, i32) {
    %c0_i32 = arith.constant 0 : i32
    %c0_i32_0 = arith.constant 0 : i32
    %c0_i32_1 = arith.constant 0 : i32
    return %c0_i32, %c0_i32_0 : i32, i32
  }
  func.func @transform_4(%arg0: i32) -> (i32, i32, i32) {
    %c0_i32 = arith.constant 0 : i32
    %c0_i32_0 = arith.constant 0 : i32
    %c0_i32_1 = arith.constant 0 : i32
    return %arg0, %c0_i32, %c0_i32_0 : i32, i32, i32
  }
}

</mosaic_0001>

<bundles_post_ra>
// kernel: tpu_custom_call.1
= control target key start
LH: loop header
LB: loop body
LE: loop exit
PB: predicated region body
PF: predicated region fallthrough
CT: control target
= control target key end

     0   :  { %9 = vsyncpa [#allocation3], 0  ;;  %s1353_s0 = inlined_call_operand.hbm [shape: f32[2,8,32], index: 0, kind: input, shape index: {}]   ;;  %s1354_s1 = inlined_call_operand.hbm [shape: f32[32,128], index: 1, kind: input, shape index: {}]   ;;  %s1355_s2 = inlined_call_operand.hbm [shape: f32[32,128], index: 2, kind: input, shape index: {}]   ;;  %s1356_s3 = inlined_call_operand.hbm [shape: f32[32,128], index: 3, kind: input, shape index: {}]   ;;  %s1357_s4 = inlined_call_operand.hbm [shape: f32[2,8,128], index: 4, kind: output, shape index: {}]  }
   0x1   :  { %11 = vsyncpa [#allocation3 + $0x1], 0 }
   0x2   :  { %12 = vsyncpa [#allocation6], 0 }
   0x3   :  { %13 = vsyncpa [#allocation9], 0 }
   0x4   :  { %14 = vsyncpa [#allocation4], 0 }
   0x5   :  { %16 = vsyncpa [#allocation4 + $0x1], 0  ;;  %s1146_s15 = smov 0   ;;  %s1148_s16 = smov 0  }
   0x6   :  { %s1150_s17 = smov 0   ;;  %s1152_s18 = smov 0  }
   0x7 LB: > { %s1167_s19 = sadd.s32 4294967295, %s1110_s18   ;;  %s763_s20 = sadd.s32 4294967294, %s1110_s18   ;;  %s1110_s18 = sphi %s1152_s18, %s1381_s18   ;;  %s1106_s17 = sphi %s1150_s17, %s1380_s17   ;;  %s1102_s16 = sphi %s1148_s16, %s1379_s16   ;;  %s1098_s15 = sphi %s1146_s15, %s1378_s15  }
   0x8   : > { %p42_p0 = scmp.ne.s32.totalorder %s1102_s16, %s1098_s15  ;;  %p1358_p1 = scmp.eq.s32.totalorder %s1167_s19, 0 }
   0x9   : > { %p135_p3 = scmp.eq.s32.totalorder %s763_s20, 1  ;;  %p764_p5 = scmp.ge.s32.totalorder %s1110_s18, 1 }
   0xa   : > { %p1176_p4 = por %p1358_p1, %p42_p0  ;;  %p142_p7 = scmp.lt.s32.totalorder %s1110_s18, 3 }
   0xb   : > { %p1181_p6 = por %p135_p3, %p42_p0  ;;  %s1112_s24 = smov [#allocation5]  }
   0xc   : > { %s1362_s21 = scalar_select %p1176_p4, 1, 0 }
   0xd   : > { %s1363_s22 = scalar_select %p1181_p6, 1, 0 }
   0xe   : > { %p1186_p8 = pnand %p764_p5, %p142_p7  ;;  %s154_s25 = sshll.u32 %s1112_s24, 4  ;;  %s155_s25 = int_to_ptr.vmem [resolvable:$true] %s154_s25 }
   0xf   : > { %s1113_s27 = smov [#allocation7]   ;;  %s1114_s29 = smov [#allocation8]  }
  0x10   : > { %s1364_s23 = scalar_select %p1186_p8, 1, 0 }
  0x11   : > { %p863_p9 = pneg %p1186_p8  ;;  %s167_s28 = sshll.u32 %s1113_s27, 4  ;;  %s168_s28 = int_to_ptr.vmem [resolvable:$true] %s167_s28 }
  0x12   : > { %s180_s30 = sshll.u32 %s1114_s29, 4  ;;  %s943_s5 = scalar_lea.vmem %s155_s25, 512  ;;  %s181_s30 = int_to_ptr.vmem [resolvable:$true] %s180_s30 }
  0x13   : > { %p1195_p11 = pnand %p863_p9, %p1358_p1  ;;  %p944_p13 = scmp.ne.s32.totalorder %s155_s25, %s943_s5 }
  0x14   : > { %p951_p5 = scmp.lt.s32.totalorder %s155_s25, %s155_s25  ;;  %p952_p7 = scmp.lt.s32.totalorder %s943_s5, %s943_s5 }
  0x15   : > { %p934_p12 = pneg %p1195_p11 }
  0x16   : > { %p953_p9 = por %p952_p7, %p951_p5 }
  0x17   : > { %p946_p0 = pnand %p944_p13, %p934_p12 }
  0x19   : > { %p947_p3 = pneg %p946_p0 }
  0x1b   : > { %p954_p10 = pnand %p953_p9, %p947_p3 }
  0x1d   : > { %957 = shalt.err (!%p954_p10)
}
  0x1e   : > { %s1115_s6 = smov 128   ;;  %s1116_s7 = smov 8  }
  0x1f   : > { %866 = dma.hbm_to_vmem [thread:$0]  (!%p1195_p11), %s1354_s1, 512, %s155_s25, [#allocation6], %s1115_s6, %s1115_s6, %s1116_s7  }
  0x20   : > { %s969_s10 = scalar_lea.vmem %s168_s28, 512  ;;  %p977_p2 = scmp.lt.s32.totalorder %s168_s28, %s168_s28 }
  0x21   : > { %p970_p1 = scmp.ne.s32.totalorder %s168_s28, %s969_s10  ;;  %p978_p6 = scmp.lt.s32.totalorder %s969_s10, %s969_s10 }
  0x23   : > { %p972_p13 = pnand %p970_p1, %p934_p12  ;;  %p979_p5 = por %p978_p6, %p977_p2 }
  0x25   : > { %p973_p0 = pneg %p972_p13 }
  0x27   : > { %p980_p3 = pnand %p979_p5, %p973_p0 }
  0x29   : > { %983 = shalt.err (!%p980_p3)
}
  0x2a   : > { %869 = dma.hbm_to_vmem [thread:$0]  (!%p1195_p11), %s1355_s2, 512, %s168_s28, [#allocation6], %s1115_s6, %s1115_s6, %s1116_s7  }
  0x2b   : > { %s995_s13 = scalar_lea.vmem %s181_s30, 512  ;;  %p1003_p9 = scmp.lt.s32.totalorder %s181_s30, %s181_s30 }
  0x2c   : > { %p996_p10 = scmp.ne.s32.totalorder %s181_s30, %s995_s13  ;;  %p1004_p13 = scmp.lt.s32.totalorder %s995_s13, %s995_s13 }
  0x2e   : > { %p998_p7 = pnand %p996_p10, %p934_p12  ;;  %p1005_p4 = por %p1004_p13, %p1003_p9 }
  0x30   : > { %p999_p1 = pneg %p998_p7 }
  0x32   : > { %p1006_p2 = pnand %p1005_p4, %p999_p1 }
  0x34   : > { %1009 = shalt.err (!%p1006_p2)
}
  0x35   : > { %872 = dma.hbm_to_vmem [thread:$0]  (!%p1195_p11), %s1356_s3, 512, %s181_s30, [#allocation9], %s1115_s6, %s1115_s6, %s1116_s7  }
  0x36   : > { %s1226_s24 = sadd.s32 1, %s1110_s18   ;;  %s29_s26 = sadd.s32 1, %s1106_s17 }
  0x37   : > { %s26_s25 = ssub.s32 %s1110_s18, %s1226_s24  ;;  %p36_p6 = scmp.ne.s32.totalorder %s1106_s17, %s1102_s16 }
  0x38   : > { %p27_p4 = scmp.eq.s32.totalorder %s26_s25, 0  ;;  %p37_p12 = scmp.eq.s32.totalorder %s1110_s18, 0 }
  0x39   : > { %p884_p0 = scmp.lt.s32.totalorder %s1110_s18, 2  ;;  %p1366_p3 = scmp.eq.s32.totalorder %s1167_s19, 1 }
  0x3a   : > { %s1236_s27 = scalar_select %p27_p4, %s1106_s17, %s29_s26  }
  0x3b   : > { %p38_p5 = por %p37_p12, %p36_p6  ;;  %p1240_p10 = por %p1366_p3, %p36_p6 }
  0x3c   : > { %s194_s29 = sand.u32 1, %s1106_s17   ;;  %s770_s5 = sshll.u32 %s1110_s18, 7 }
  0x3d   : > { %s1367_s28 = scalar_select %p1240_p10, 1, 0 }
  0x3e   : > { %s769_s30 = sshll.u32 %s194_s29, 3  ;;  %s1249_s8 = scalar_lea.hbm %s1353_s0, %s770_s5 }
  0x3f   : > { %s198_s9 = scalar_lea.vmem [#allocation2], %s769_s30  ;;  %p1251_p11 = pnand %p884_p0, %p38_p5 }
  0x40   : > { %s205_s10 = sshll.u32 %s198_s9, 4  ;;  %s195_s12 = scalar_lea.sflag [#allocation3], %s194_s29  ;;  %s206_s10 = int_to_ptr.vmem [resolvable:$true] %s205_s10 }
  0x41   : > { %s1010_s13 = scalar_lea.hbm %s1249_s8, 128  ;;  %p1012_p1 = pneg %p1251_p11 }
  0x42   : > { %p1011_p7 = scmp.ne.s32.totalorder %s1249_s8, %s1010_s13  ;;  %s1015_s25 = scalar_lea.hbm %s1353_s0, 256 }
  0x43   : > { %p1016_p2 = scmp.lt.s32.totalorder %s1249_s8, %s1353_s0  ;;  %p1017_p4 = scmp.lt.s32.totalorder %s1015_s25, %s1010_s13 }
  0x44   : > { %p1013_p9 = pnand %p1012_p1, %p1011_p7 }
  0x45   : > { %p1018_p6 = por %p1017_p4, %p1016_p2 }
  0x46   : > { %p1014_p13 = pneg %p1013_p9 }
  0x48   : > { %p1019_p12 = pnand %p1018_p6, %p1014_p13 }
  0x4a   : > { %1022 = shalt.err (!%p1019_p12)
}
  0x4b   : > { %s1023_s30 = scalar_lea.vmem %s206_s10, 128  ;;  %s1117_s29 = smov [#allocation2]  }
  0x4c   : > { %p1024_p0 = scmp.ne.s32.totalorder %s206_s10, %s1023_s30  ;;  %s1028_s6 = sshll.u32 %s1117_s29, 4  ;;  %s1029_s6 = int_to_ptr.vmem [resolvable:$false] %s1028_s6 }
  0x4d   : > { %s1030_s7 = scalar_lea.vmem %s1029_s6, 256  ;;  %p1031_p7 = scmp.lt.s32.totalorder %s206_s10, %s1029_s6 }
  0x4e   : > { %p1026_p5 = pnand %p1024_p0, %p1012_p1  ;;  %p1032_p9 = scmp.lt.s32.totalorder %s1030_s7, %s1023_s30 }
  0x50   : > { %p1027_p3 = pneg %p1026_p5  ;;  %p1033_p10 = por %p1032_p9, %p1031_p7 }
  0x52   : > { %p1034_p8 = pnand %p1033_p10, %p1027_p3 }
  0x54   : > { %1037 = shalt.err (!%p1034_p8)
}
  0x55   : > { %876 = dma.hbm_to_vmem [thread:$0]  (!%p1251_p11), %s1249_s8, 128, %s206_s10, %s195_s12  }
  0x56   : > { %p1369_p13 = scmp.ne.s32.totalorder %s1364_s23, 0 }
  0x57   : > { %s1272_s9 = sand.u32 (!%p1369_p13), 1, %s1102_s16   ;;  %p1370_p8 = scmp.ne.s32.totalorder (!%p1369_p13), %s1362_s21, 0 }
  0x58   : > { %214 = sbr.rel (%p1369_p13) target bundleno = 1027 (0x403), region = 36  ;;  %s772_s13 = sshll.u32 (!%p1369_p13), %s1272_s9, 3 }
  0x59   : > { %s217_s14 = scalar_lea.sflag (!%p1369_p13), [#allocation3], %s1272_s9  ;;  %s1278_s20 = scalar_lea.vmem (!%p1369_p13), [#allocation2], %s772_s13 }
  0x5d   : > { %1081 = dma.done.wait (%p1370_p8), %s217_s14, 128  }
  0x5e   : > { %1083 = vsyncadd (%p1370_p8), %s217_s14, 4294967168  ;;  %p1371_p10 = scmp.eq.s32.totalorder %s1167_s19, 0 }
  0x60   : > { %1085 = dma.done.wait (%p1371_p10), [#allocation6], 1024   ;;  %p1372_p11 = pmov %p1371_p10 }
  0x61   : > { %p1373_p1 = pmov %p1371_p10 }
  0x62   : > { %1087 = vsyncadd (%p1372_p11), [#allocation6], 4294966272 }
  0x63   : > { %1089 = dma.done.wait (%p1373_p1), [#allocation9], 512   ;;  %p1374_p2 = pmov %p1373_p1 }
  0x64   : > { %v1118_v0 = vmov 0.0   ;;  %vm1119_vm0 = vmmov 0   ;;  %v339_v1 = vld [vmem:[#allocation7 + $0x18] sm:$0xff]  ;;  %v338_v3 = vld [vmem:[#allocation7 + $0x10] sm:$0xff]  ;;  %v337_v5 = vld [vmem:[#allocation7 + $0x8] sm:$0xff]  ;;  %vm262_vm1 = vcmask 261120   ;;  %v555_v18 = vlaneseq }
  0x65   : > { %1091 = vsyncadd (%p1374_p2), [#allocation9], 4294966784  ;;  %815 = vmatprep.subr.mxu1 %v1118_v0  ;;  %804 = vmatprep.subr.mxu0 %v1118_v0  ;;  %v261_v2 = vld [vmem:[#allocation5 + $0x18] sm:$0xff]  ;;  %v260_v4 = vld [vmem:[#allocation5 + $0x10] sm:$0xff]  ;;  %vm561_vm3 = vcmask 64512   ;;  %s256_s21 = scalar_lea.vmem [#allocation10], %s772_s13 }
  0x66   : > { %823 = vmatprep.mubr.msk.f32.mxu1 %vm1119_vm0, %v1118_v0  ;;  %812 = vmatprep.mubr.msk.f32.mxu0 %vm1119_vm0, %v1118_v0  ;;  %v259_v6 = vld [vmem:[#allocation5 + $0x8] sm:$0xff]  ;;  %v336_v7 = vld [vmem:[#allocation7] sm:$0xff]  ;;  %v257_v9 = vld [vmem:[%s1278_s20] sm:$0xff]  ;;  %v556_v19 = vshrl.u32 %v555_v18, 7  ;;  %v558_v20 = vand.u32 127, %v555_v18  ;;  %s664_s23 = sshll.u32 %s256_s21, 4  ;;  %s1307_s23 = int_to_ptr.vmem [resolvable:$true] %s664_s23 }
  0x67   : > { %816 = vmatpush3.msra.mxu1 %v339_v1  ;;  %805 = vmatpush3.msra.mxu0 %v261_v2  ;;  %v258_v8 = vld [vmem:[#allocation5] sm:$0xff]  ;;  %v413_v14 = vld [vmem:[#allocation8 + $0x18] sm:$0xff]  ;;  %v412_v15 = vld [vmem:[#allocation8 + $0x10] sm:$0xff]  ;;  %s782_s8 = sshll.u32 %s1167_s19, 7  ;;  %s651_s25 = scalar_lea.sflag [#allocation4], %s1272_s9 }
  0x68   : > { %817 = vmatprep.subr.mxu1 %v1118_v0  ;;  %806 = vmatprep.subr.mxu0 %v1118_v0  ;;  %v411_v16 = vld [vmem:[#allocation8 + $0x8] sm:$0xff]  ;;  %v410_v17 = vld [vmem:[#allocation8] sm:$0xff]  ;;  %vm559_vm2 = vcmp.ge.s32.totalorder %v556_v19, %v558_v20  ;;  %s1312_s12 = scalar_lea.hbm %s1357_s4, %s782_s8  ;;  %s1038_s26 = scalar_lea.vmem %s1307_s23, 128 }
  0x69   : > { %818 = vmatpush3.msra.mxu1 %v338_v3  ;;  %807 = vmatpush3.msra.mxu0 %v260_v4  ;;  %p1039_p4 = scmp.ne.s32.totalorder %s1307_s23, %s1038_s26  ;;  %p1375_p6 = scmp.ne.s32.totalorder %s1367_s28, 0 }
  0x6a   : > { %819 = vmatprep.subr.mxu1 %v1118_v0  ;;  %808 = vmatprep.subr.mxu0 %v1118_v0  ;;  %s1120_s19 = smov [#allocation10]  }
  0x6b   : > { %820 = vmatpush3.msra.mxu1 %v337_v5  ;;  %809 = vmatpush3.msra.mxu0 %v259_v6  ;;  %p1040_p12 = pnand %p1039_p4, %p1375_p6  ;;  %s1042_s5 = sshll.u32 %s1120_s19, 4  ;;  %s1043_s5 = int_to_ptr.vmem [resolvable:$false] %s1042_s5 }
  0x6c   : > { %821 = vmatprep.subr.mxu1 %v1118_v0  ;;  %810 = vmatprep.subr.mxu0 %v1118_v0  ;;  %s1044_s30 = scalar_lea.vmem %s1043_s5, 256  ;;  %p1045_p5 = scmp.lt.s32.totalorder %s1307_s23, %s1043_s5 }
  0x6d   : > { %822 = vmatpush3.msra.mxu1 %v336_v7  ;;  %811 = vmatpush3.msra.mxu0 %v258_v8  ;;  %p1041_p0 = pneg %p1040_p12  ;;  %p1046_p3 = scmp.lt.s32.totalorder %s1044_s30, %s1038_s26 }
  0x6e   : > { %824 = vmatmul.mubr.msk.f32.vlgmr.msra.gmra.mxu1 %vm262_vm1, %v257_v9  ;;  %813 = vmatmul.mubr.msk.f32.vlgmr.msra.gmra.mxu0 %vm262_vm1, %v257_v9 }
  0x6f   : > { %837 = vmatprep.subr.mxu1 %v1118_v0  ;;  %839 = vmatprep.mubr.msk.f32.mxu1 %vm1119_vm0, %v1118_v0  ;;  %p1047_p7 = por %p1046_p3, %p1045_p5 }
  0x70   : > { %826 = vmatprep.subr.mxu0 %v1118_v0  ;;  %834 = vmatprep.mubr.msk.f32.mxu0 %vm1119_vm0, %v1118_v0 }
  0x71   : > { %827 = vmatpush3.msra.mxu0 %v413_v14  ;;  %p1048_p9 = pnand %p1047_p7, %p1041_p0 }
  0x72   : > { %828 = vmatprep.subr.mxu0 %v1118_v0 }
  0x73   : > { %829 = vmatpush3.msra.mxu0 %v412_v15 }
  0x74   : > { %830 = vmatprep.subr.mxu0 %v1118_v0 }
  0x75   : > { %831 = vmatpush3.msra.mxu0 %v411_v16 }
  0x76   : > { %832 = vmatprep.subr.mxu0 %v1118_v0 }
  0x77   : > { %833 = vmatpush3.msra.mxu0 %v410_v17 }
  0x78   : > { %835 = vmatmul.mubr.msk.f32.vlgmr.msra.gmra.mxu0 %vm262_vm1, %v257_v9 }
 0x12e   : > { %v406_v10 = vpop.f32.mrf.mxu1  ;;  %v332_v11 = vpop.f32.mrf.mxu0 }
 0x12f   : > { %838 = vmatpush3.xpose.msra.mxu1 %v406_v10 }
 0x130   : > { %v825_v12 = vpop.f32.mrf.mxu1  ;;  %v814_v13 = vpop.f32.mrf.mxu0  ;;  %842 = vmatprep.subr.mxu1 %v1118_v0 }
 0x132   : > { %840 = vmatmul.mubr.f32.vlgmr.msra.gmra.mxu1 %v332_v11 }
 0x133   : > { %844 = vmatprep.mubr.msk.f32.mxu1 %vm1119_vm0, %v1118_v0 }
 0x138   : > { %v480_v31 = vpop.f32.mrf.mxu0 }
 0x139   : > { %843 = vmatpush3.msra.mxu1 %v480_v31 }
 0x13a   : > { %v836_v32 = vpop.f32.mrf.mxu0 }
 0x1f2   : > { %v550_v21 = vpop.f32.mrf.mxu1 }
 0x1f3   : > { %v554_v22 = vmul.f32 0.25, %v550_v21 }
 0x1f4   : > { %v841_v23 = vpop.f32.mrf.mxu1 }
 0x1f5   : > { %v560_v24 = vsel %vm559_vm2, %v554_v22, -1e+30 }
 0x1f6   : > { %v562_v25 = vsel %vm561_vm3, %v560_v24, -inf }
 0x1f7   : > { %563 = vmax.xlane.f32.xlu0 %v562_v25 }
 0x280   : > { %v564_v26 = vpop.xlane.xlu0 %563 }
 0x281   : > { %v565_v27 = vsub.f32 %v560_v24, %v564_v26 }
 0x283   : > { %v566_v28 = vmul.f32 1.442695, %v565_v27 }
 0x285   : > { %928 = vpow2.f32 %v566_v28 }
 0x292   : > { %v929_v29 = vpop.eup %928 }
 0x293   : > { %v568_v30 = vsel %vm561_vm3, %v929_v29, 0.0 }
 0x294   : > { %569 = vadd.xlane.f32.xlu0 %v568_v30 }
 0x31d   : > { %v570_v33 = vpop.xlane.xlu0 %569 }
 0x31e   : > { %930 = vrcp.f32 %v570_v33 }
 0x32b   : > { %v931_v34 = vpop.eup %930 }
 0x32c   : > { %v572_v35 = vmul.f32 %v931_v34, %v570_v33 }
 0x32e   : > { %v573_v36 = vsub.f32 2.0, %v572_v35 }
 0x330   : > { %v574_v37 = vmul.f32 %v931_v34, %v573_v36 }
 0x332   : > { %v575_v38 = vmul.f32 %v929_v29, %v574_v37 }
 0x334   : > { %845 = vmatmul.mubr.msk.f32.vlgmr.msra.gmra.mxu1 %vm561_vm3, %v575_v38 }
 0x3f4   : > { %v645_v39 = vpop.f32.mrf.mxu1 }
 0x3f5   : > { %649 = vst [vmem:[%s256_s21] sm:$0xff] %v645_v39 }
 0x3f6   : > { %v846_v40 = vpop.f32.mrf.mxu1 }
 0x3f7   : > { %1051 = shalt.err (!%p1048_p9)
}
 0x3f8   : > { %s1052_s29 = scalar_lea.hbm %s1312_s12, 128  ;;  %s1056_s9 = scalar_lea.hbm %s1357_s4, 256 }
 0x3f9   : > { %p1053_p13 = scmp.ne.s32.totalorder %s1312_s12, %s1052_s29  ;;  %p1057_p11 = scmp.lt.s32.totalorder %s1312_s12, %s1357_s4 }
 0x3fa   : > { %p1058_p1 = scmp.lt.s32.totalorder %s1056_s9, %s1052_s29 }
 0x3fb   : > { %p1054_p8 = pnand %p1053_p13, %p1375_p6 }
 0x3fc   : > { %p1059_p2 = por %p1058_p1, %p1057_p11 }
 0x3fd   : > { %p1055_p10 = pneg %p1054_p8 }
 0x3ff   : > { %p1060_p4 = pnand %p1059_p2, %p1055_p10 }
 0x401   : > { %1063 = shalt.err (!%p1060_p4)
}
 0x402   : > { %861 = dma.vmem_to_hbm [thread:$0]  (%p1375_p6), %s1307_s23, 128, %s1312_s12, %s651_s25  }
 0x403 PF: > { %s676_s20 = sand.u32 1, %s1098_s15   ;;  %p1376_p12 = scmp.ne.s32.totalorder %s1363_s22, 0 }
 0x404   : > { %p1377_p0 = scmp.ge.s32.totalorder %s1110_s18, 2  ;;  %s677_s21 = scalar_lea.sflag [#allocation4], %s676_s20 }
 0x406   : > { %p878_p5 = pnand %p1377_p0, %p1376_p12 }
 0x408   : > { %p879_p3 = pneg %p878_p5 }
 0x40a   : > { %1093 = dma.done.wait (%p879_p3), %s677_s21, 128  }
 0x40b   : > { %1095 = vsyncadd (%p879_p3), %s677_s21, 4294967168  ;;  %p19_p7 = scmp.ge.s32.totalorder %s1226_s24, 4   ;;  %s1378_s15 = smov %s1102_s16 }
 0x40c   : > { %s1379_s16 = smov %s1106_s17  ;;  %s1380_s17 = smov %s1236_s27 }
 0x40d   : > { %s1381_s18 = smov %s1226_s24  ;;  %21 = sbr.rel (!%p19_p7) target bundleno = 7 (0x7), region = 93 }
 0x412   :  { %682 = vsyncpa [#allocation3], 1 }
 0x413   :  { %684 = vsyncpa [#allocation3 + $0x1], 1 }
 0x414   :  { %685 = vsyncpa [#allocation6], 1 }
 0x415   :  { %686 = vsyncpa [#allocation9], 1 }
 0x416   :  { %687 = vsyncpa [#allocation4], 1 }
 0x417   :  { %689 = vsyncpa [#allocation4 + $0x1], 1 }

</bundles_post_ra>
